<compile_context>
chip_gen: v6e
topology: v6e:2x2x1
jax: 0.10.0
libtpu: 0.0.40
codegen_flags: <defaults>
</compile_context>

<pallas_src>
import functools

import jax
import jax.numpy as jnp
from jax.experimental import pallas as pl
from jax.experimental.pallas import tpu as pltpu


# ----------------------------- Pallas kernel ------------------------------- #

def _res_linear_kernel(xk_ref, w_ref, xr_ref, b_ref, o_ref, acc_ref):
    """One (tm, tn) output tile of  y = x + x @ W + b.

    grid = (M//tm, C//tn, C//tk); the last axis is the contraction (K) axis.
      xk_ref : (tm, tk)  x slice feeding the matmul contraction
      w_ref  : (tk, tn)  W slice
      xr_ref : (tm, tn)  x slice for the residual "+ x"
      b_ref  : (1,  tn)  bias slice
      o_ref  : (tm, tn)  output tile (resident across the K axis)
      acc_ref: (tm, tn)  f32 VMEM accumulator
    """
    k = pl.program_id(2)

    @pl.when(k == 0)
    def _init():
        acc_ref[...] = jnp.zeros_like(acc_ref)

    acc_ref[...] += jnp.dot(xk_ref[...], w_ref[...],
                            preferred_element_type=jnp.float32)

    @pl.when(k == pl.num_programs(2) - 1)
    def _finalize():
        y = (acc_ref[...]
             + xr_ref[...].astype(jnp.float32)
             + b_ref[...].astype(jnp.float32))
        o_ref[...] = y.astype(o_ref.dtype)


# ------------------------------ JAX wrapper -------------------------------- #

def _round_up(x, m):
    return ((x + m - 1) // m) * m


def _pick_feature_tile(c):
    # Lane axis: either a multiple of 128 (lane-dense, unmasked stores) or the
    # full feature dimension (required by the (8,128) BlockSpec rule).
    if c % 128 == 0:
        return min(c, 256)
    return c


@functools.partial(jax.jit, static_argnames=("block_rows",))
def invertible_res_linear(x, weight, bias=None, *, block_rows=128):
    """Pallas forward of InvertibleResLinear: y = x + x @ W (+ b)."""
    M, C = x.shape
    assert weight.shape == (C, C), weight.shape
    if bias is None:
        bias = jnp.zeros((C,), x.dtype)

    tn = tk = _pick_feature_tile(C)
    tm = min(block_rows, _round_up(M, 8))        # row tile, multiple of 8 sublanes
    m_pad = _round_up(max(M, tm), tm)
    x_p = jnp.pad(x, ((0, m_pad - M), (0, 0))) if m_pad != M else x
    b2 = bias.reshape(1, C)

    grid = (m_pad // tm, C // tn, C // tk)       # reduction axis last

    out = pl.pallas_call(
        _res_linear_kernel,
        out_shape=jax.ShapeDtypeStruct((m_pad, C), x.dtype),
        grid_spec=pltpu.PrefetchScalarGridSpec(
            num_scalar_prefetch=0,
            grid=grid,
            in_specs=[
                pl.BlockSpec((tm, tk), lambda i, j, k: (i, k)),   # x (matmul)
                pl.BlockSpec((tk, tn), lambda i, j, k: (k, j)),   # W
                pl.BlockSpec((tm, tn), lambda i, j, k: (i, j)),   # x (residual)
                pl.BlockSpec((1, tn), lambda i, j, k: (0, j)),    # bias
            ],
            out_specs=pl.BlockSpec((tm, tn), lambda i, j, k: (i, j)),
            scratch_shapes=[pltpu.VMEM((tm, tn), jnp.float32)],
        ),
        compiler_params=pltpu.CompilerParams(
            dimension_semantics=("parallel", "parallel", "arbitrary"),
        ),
    )(x_p, weight, x_p, b2)

    return out[:M] if m_pad != M else out


# --------------------------- pure-JAX reference ----------------------------- #

def _ref_forward(x, w, b=None):
    fx = x @ w
    if b is not None:
        fx = fx + b
    return x + fx


# ---------------------------------- main ------------------------------------ #

if __name__ == "__main__":
    key = jax.random.PRNGKey(0)
    k1, k2, k3, k4, k5 = jax.random.split(key, 5)

    # Case 1: lane-dense feature dim (C=128), two row tiles (grid = (2,1,1)).
    M1, C1 = 256, 128
    x1 = jax.random.normal(k1, (M1, C1), jnp.float32)
    w1 = (1.0 / C1) * jax.random.normal(k2, (C1, C1), jnp.float32)  # PyTorch init: N(0, 1/C)
    b1 = 0.1 * jax.random.normal(k3, (C1,), jnp.float32)
    y1 = jax.block_until_ready(invertible_res_linear(x1, w1, b1))
    r1 = _ref_forward(x1, w1, b1)
    assert y1.shape == (M1, C1), y1.shape
    err1 = float(jnp.max(jnp.abs(y1 - r1)))
    assert jnp.allclose(y1, r1, atol=1e-5, rtol=1e-5), f"max abs err = {err1}"

    # Case 2: small ragged batch, narrow feature dim, bias=False path.
    M2, C2 = 10, 32
    x2 = jax.random.normal(k4, (M2, C2), jnp.float32)
    w2 = (1.0 / C2) * jax.random.normal(k5, (C2, C2), jnp.float32)
    y2 = jax.block_until_ready(invertible_res_linear(x2, w2, None))
    r2 = _ref_forward(x2, w2, None)
    assert y2.shape == (M2, C2), y2.shape
    err2 = float(jnp.max(jnp.abs(y2 - r2)))
    assert jnp.allclose(y2, r2, atol=1e-5, rtol=1e-5), f"max abs err = {err2}"

    print("KERNEL_OK")
</pallas_src>

<mosaic_0001>
module attributes {stable_mosaic.version = 11 : i64} {
  func.func @_res_linear_kernel(%arg0: i32, %arg1: i32, %arg2: i32, %arg3: memref<128x128xf32, #tpu.memory_space<vmem>>, %arg4: memref<128x128xf32, #tpu.memory_space<vmem>>, %arg5: memref<128x128xf32, #tpu.memory_space<vmem>>, %arg6: memref<1x128xf32, #tpu.memory_space<vmem>>, %arg7: memref<128x128xf32, #tpu.memory_space<vmem>>, %arg8: memref<128x128xf32, #tpu.memory_space<vmem>>) attributes {dimension_semantics = [#tpu.dimension_semantics<parallel>, #tpu.dimension_semantics<parallel>, #tpu.dimension_semantics<arbitrary>], iteration_bounds = array<i64: 2, 1, 1>, scalar_prefetch = 0 : i64, scratch_operands = 1 : i64, tpu.core_type = #tpu.core_type<tc>, window_params = [{transform_indices = @transform_0, window_bounds = array<i64: 128, 128>}, {transform_indices = @transform_1, window_bounds = array<i64: 128, 128>}, {transform_indices = @transform_2, window_bounds = array<i64: 128, 128>}, {transform_indices = @transform_3, window_bounds = array<i64: 1, 128>}, {transform_indices = @transform_4, window_bounds = array<i64: 128, 128>}]} {
    %c0_i32 = arith.constant 0 : i32
    %0 = arith.cmpi eq, %arg2, %c0_i32 : i32
    %1 = arith.extui %0 : i1 to i32
    %c0_i32_0 = arith.constant 0 : i32
    %2 = arith.cmpi ne, %1, %c0_i32_0 : i32
    scf.if %2 {
      %cst_10 = arith.constant 0.000000e+00 : f32
      %12 = vector.broadcast %cst_10 : f32 to vector<128x128xf32>
      %c0_11 = arith.constant 0 : index
      %c0_12 = arith.constant 0 : index
      %13 = vector.load %arg8[%c0_11, %c0_12] : memref<128x128xf32, #tpu.memory_space<vmem>>, vector<128x128xf32>
      tpu.vector_store %arg8[%c0_11, %c0_12], %12 {strides = array<i32>} : memref<128x128xf32, #tpu.memory_space<vmem>>, vector<128x128xf32>,
    } else {
    }
    %c0 = arith.constant 0 : index
    %c0_1 = arith.constant 0 : index
    %3 = vector.load %arg8[%c0, %c0_1] : memref<128x128xf32, #tpu.memory_space<vmem>>, vector<128x128xf32>
    %c0_2 = arith.constant 0 : index
    %c0_3 = arith.constant 0 : index
    %4 = vector.load %arg3[%c0_2, %c0_3] : memref<128x128xf32, #tpu.memory_space<vmem>>, vector<128x128xf32>
    %c0_4 = arith.constant 0 : index
    %c0_5 = arith.constant 0 : index
    %5 = vector.load %arg4[%c0_4, %c0_5] : memref<128x128xf32, #tpu.memory_space<vmem>>, vector<128x128xf32>
    %cst = arith.constant dense<0.000000e+00> : vector<128x128xf32>
    %6 = tpu.matmul %4, %5, %cst {dimension_numbers = #tpu.dot_dimension_numbers<[1], [0], [0], [1], [0, 0, 1, 1], [], []>} : vector<128x128xf32>, vector<128x128xf32>, vector<128x128xf32> -> vector<128x128xf32>
    %7 = arith.addf %3, %6 : vector<128x128xf32>
    %c0_6 = arith.constant 0 : index
    %c0_7 = arith.constant 0 : index
    %8 = vector.load %arg8[%c0_6, %c0_7] : memref<128x128xf32, #tpu.memory_space<vmem>>, vector<128x128xf32>
    tpu.vector_store %arg8[%c0_6, %c0_7], %7 {strides = array<i32>} : memref<128x128xf32, #tpu.memory_space<vmem>>, vector<128x128xf32>,
    %c0_i32_8 = arith.constant 0 : i32
    %9 = arith.cmpi eq, %arg2, %c0_i32_8 : i32
    %10 = arith.extui %9 : i1 to i32
    %c0_i32_9 = arith.constant 0 : i32
    %11 = arith.cmpi ne, %10, %c0_i32_9 : i32
    scf.if %11 {
      %c0_10 = arith.constant 0 : index
      %c0_11 = arith.constant 0 : index
      %12 = vector.load %arg8[%c0_10, %c0_11] : memref<128x128xf32, #tpu.memory_space<vmem>>, vector<128x128xf32>
      %c0_12 = arith.constant 0 : index
      %c0_13 = arith.constant 0 : index
      %13 = vector.load %arg5[%c0_12, %c0_13] : memref<128x128xf32, #tpu.memory_space<vmem>>, vector<128x128xf32>
      %14 = arith.addf %12, %13 : vector<128x128xf32>
      %c0_14 = arith.constant 0 : index
      %c0_15 = arith.constant 0 : index
      %15 = vector.load %arg6[%c0_14, %c0_15] : memref<1x128xf32, #tpu.memory_space<vmem>>, vector<1x128xf32>
      %16 = vector.broadcast %15 : vector<1x128xf32> to vector<128x128xf32>
      %17 = arith.addf %14, %16 : vector<128x128xf32>
      %c0_16 = arith.constant 0 : index
      %c0_17 = arith.constant 0 : index
      %18 = vector.load %arg7[%c0_16, %c0_17] : memref<128x128xf32, #tpu.memory_space<vmem>>, vector<128x128xf32>
      tpu.vector_store %arg7[%c0_16, %c0_17], %17 {strides = array<i32>} : memref<128x128xf32, #tpu.memory_space<vmem>>, vector<128x128xf32>,
    } else {
    }
    return
  }
  func.func @transform_0(%arg0: i32, %arg1: i32, %arg2: i32) -> (i32, i32) {
    %c0_i32 = arith.constant 0 : i32
    return %arg0, %arg2 : i32, i32
  }
  func.func @transform_1(%arg0: i32, %arg1: i32, %arg2: i32) -> (i32, i32) {
    %c0_i32 = arith.constant 0 : i32
    return %arg2, %arg1 : i32, i32
  }
  func.func @transform_2(%arg0: i32, %arg1: i32, %arg2: i32) -> (i32, i32) {
    %c0_i32 = arith.constant 0 : i32
    return %arg0, %arg1 : i32, i32
  }
  func.func @transform_3(%arg0: i32, %arg1: i32, %arg2: i32) -> (i32, i32) {
    %c0_i32 = arith.constant 0 : i32
    %c0_i32_0 = arith.constant 0 : i32
    return %c0_i32, %arg1 : i32, i32
  }
  func.func @transform_4(%arg0: i32, %arg1: i32, %arg2: i32) -> (i32, i32) {
    %c0_i32 = arith.constant 0 : i32
    return %arg0, %arg1 : i32, i32
  }
}

</mosaic_0001>

<bundles_post_ra>
// kernel: invertible_res_linear.1
= control target key start
LH: loop header
LB: loop body
LE: loop exit
PB: predicated region body
PF: predicated region fallthrough
CT: control target
= control target key end

     0   :  { %9 = vsyncpa [#allocation4], 0  ;;  %s1537_s0 = inlined_call_operand.hbm [shape: f32[256,128], index: 0, kind: input, shape index: {}, may-alias: {0,2}]   ;;  %s1538_s1 = inlined_call_operand.hbm [shape: f32[128,128], index: 1, kind: input, shape index: {}]   ;;  %s1539_s2 = inlined_call_operand.hbm [shape: f32[256,128], index: 2, kind: input, shape index: {}, may-alias: {0,2}]   ;;  %s1540_s3 = inlined_call_operand.vmem [shape: f32[1,128], index: 3, kind: input, shape index: {}]   ;;  %s1541_s4 = inlined_call_operand.hbm [shape: f32[256,128], index: 4, kind: output, shape index: {}]  }
   0x1   :  { %11 = vsyncpa [#allocation4 + $0x1], 0 }
   0x2   :  { %12 = vsyncpa [#allocation7], 0 }
   0x3   :  { %13 = vsyncpa [#allocation5], 0 }
   0x4   :  { %15 = vsyncpa [#allocation5 + $0x1], 0  ;;  %s1243_s15 = smov 0   ;;  %s1245_s16 = smov 0  }
   0x5   :  { %s1247_s17 = smov 0   ;;  %s1249_s18 = smov 0  }
   0x6   :  { %s1251_s19 = smov 0   ;;  %s1253_s20 = smov 0  }
   0x7 LB: > { %s40_s21 = sadd.s32 1, %s1204_s19  ;;  %s49_s22 = sadd.s32 1, %s1196_s17  ;;  %s1208_s20 = sphi %s1253_s20, %s21_s20   ;;  %s1204_s19 = sphi %s1251_s19, %s1560_s19   ;;  %s1200_s18 = sphi %s1249_s18, %s1559_s18   ;;  %s1196_s17 = sphi %s1247_s17, %s1558_s17   ;;  %s1192_s16 = sphi %s1245_s16, %s1557_s16   ;;  %s1188_s15 = sphi %s1243_s15, %s1556_s15  }
   0x8   : > { %p42_p0 = scmp.ge.s32.totalorder %s40_s21, 2  ;;  %p56_p1 = scmp.ne.s32.totalorder %s1196_s17, %s1192_s16 }
   0x9   : > { %p57_p2 = scmp.eq.s32.totalorder %s1208_s20, 0  ;;  %p982_p6 = scmp.lt.s32.totalorder %s1208_s20, 2 }
   0xa   : > { %s1562_s21 = smov (%p42_p0, %s40_s21), 0  ;;  %s219_s25 = sand.u32 1, %s1208_s20  }
   0xb   : > { %p1283_p3 = por %p57_p2, %p56_p1  ;;  %s44_s24 = ssub.s32 %s1204_s19, %s1562_s21 }
   0xc   : > { %p47_p5 = scmp.eq.s32.totalorder %s44_s24, 0  ;;  %s221_s26 = sand.u32 1, %s1196_s17  }
   0xd   : > { %s1296_s28 = sshll.u32 %s221_s26, 7  ;;  %s833_s29 = sshll.u32 %s1204_s19, 11 }
   0xe   : > { %s1294_s27 = scalar_select %p47_p5, %s1196_s17, %s49_s22  }
   0xf   : > { %s230_s6 = scalar_lea.hbm %s1537_s0, %s833_s29  ;;  %s223_s7 = scalar_lea.vmem [#allocation3], %s1296_s28 }
  0x10   : > { %s231_s8 = sshll.u32 %s223_s7, 4  ;;  %p1305_p7 = pnand %p982_p6, %p1283_p3  ;;  %s232_s8 = int_to_ptr.vmem [resolvable:$true] %s231_s8 }
  0x11   : > { %s1312_s12 = scalar_lea.hbm %s1539_s2, %s833_s29  ;;  %s1314_s13 = scalar_lea.sflag [#allocation4], %s219_s25 }
  0x12   : > { %p1040_p8 = pneg %p1305_p7  ;;  %s1051_s14 = scalar_lea.vmem %s232_s8, 2048 }
  0x13   : > { %p1052_p9 = scmp.ne.s32.totalorder %s232_s8, %s1051_s14  ;;  %s1210_s22 = smov [#allocation3]  }
  0x14   : > { %s1056_s23 = sshll.u32 %s1210_s22, 4  ;;  %s1057_s23 = int_to_ptr.vmem [resolvable:$false] %s1056_s23 }
  0x15   : > { %p1054_p10 = pnand %p1052_p9, %p1040_p8  ;;  %s1058_s24 = scalar_lea.vmem %s1057_s23, 4096 }
  0x16   : > { %p1059_p12 = scmp.lt.s32.totalorder %s232_s8, %s1057_s23  ;;  %p1060_p13 = scmp.lt.s32.totalorder %s1058_s24, %s1051_s14 }
  0x17   : > { %p1055_p11 = pneg %p1054_p10 }
  0x18   : > { %p1061_p0 = por %p1060_p13, %p1059_p12 }
  0x1a   : > { %p1062_p2 = pnand %p1061_p0, %p1055_p11 }
  0x1c   : > { %1065 = shalt.err (!%p1062_p2)
}
  0x1d   : > { %s1211_s26 = smov 128   ;;  %s1212_s25 = smov 8  }
  0x1e   : > { %973 = dma.hbm_to_vmem [thread:$0]  (!%p1305_p7), %s230_s6, 2048, %s232_s8, %s1314_s13, %s1211_s26, %s1211_s26, %s1212_s25  }
  0x1f   : > { %s245_s29 = scalar_lea.vmem [#allocation8], %s1296_s28  ;;  %s1329_s5 = sadd.s32 4294967295, %s1208_s20  }
  0x20   : > { %s253_s30 = sshll.u32 %s245_s29, 4  ;;  %s811_s7 = sadd.s32 4294967294, %s1208_s20   ;;  %s254_s30 = int_to_ptr.vmem [resolvable:$true] %s253_s30 }
  0x21   : > { %p62_p3 = scmp.ne.s32.totalorder %s1192_s16, %s1188_s15  ;;  %p1542_p5 = scmp.eq.s32.totalorder %s1329_s5, 0 }
  0x22   : > { %p170_p6 = scmp.eq.s32.totalorder %s1329_s5, 1  ;;  %p176_p9 = scmp.eq.s32.totalorder %s811_s7, 1 }
  0x23   : > { %p812_p10 = scmp.ge.s32.totalorder %s1208_s20, 1  ;;  %p1339_p11 = por %p1542_p5, %p62_p3 }
  0x24   : > { %p1346_p12 = por %p170_p6, %p56_p1  ;;  %p1350_p13 = por %p176_p9, %p62_p3 }
  0x25   : > { %p183_p0 = scmp.lt.s32.totalorder %s1208_s20, 3  ;;  %s1213_s11 = smov [#allocation6]  }
  0x26   : > { %s1547_s28 = scalar_select %p1346_p12, 1, 0 }
  0x27   : > { %s1548_s6 = scalar_select %p1350_p13, 1, 0 }
  0x28   : > { %p1355_p2 = pnand %p812_p10, %p183_p0  ;;  %s199_s14 = sshll.u32 %s1213_s11, 4  ;;  %s200_s14 = int_to_ptr.vmem [resolvable:$true] %s199_s14 }
  0x29   : > { %s1079_s22 = scalar_lea.vmem %s254_s30, 2048  ;;  %s1214_s23 = smov [#allocation8]  }
  0x2a   : > { %p966_p4 = pneg %p1355_p2  ;;  %p1080_p1 = scmp.ne.s32.totalorder %s254_s30, %s1079_s22 }
  0x2b   : > { %s1084_s24 = sshll.u32 %s1214_s23, 4  ;;  %s1085_s24 = int_to_ptr.vmem [resolvable:$false] %s1084_s24 }
  0x2c   : > { %p1082_p6 = pnand %p1080_p1, %p1040_p8  ;;  %s1086_s29 = scalar_lea.vmem %s1085_s24, 4096 }
  0x2d   : > { %p1087_p9 = scmp.lt.s32.totalorder %s254_s30, %s1085_s24  ;;  %p1088_p10 = scmp.lt.s32.totalorder %s1086_s29, %s1079_s22 }
  0x2e   : > { %p1083_p3 = pneg %p1082_p6 }
  0x2f   : > { %p1089_p0 = por %p1088_p10, %p1087_p9 }
  0x31   : > { %p1090_p5 = pnand %p1089_p0, %p1083_p3 }
  0x33   : > { %1093 = shalt.err (!%p1090_p5)
}
  0x34   : > { %976 = dma.hbm_to_vmem [thread:$0]  (!%p1305_p7), %s1312_s12, 2048, %s254_s30, %s1314_s13, %s1211_s26, %s1211_s26, %s1212_s25  }
  0x35   : > { %p1550_p8 = scmp.eq.s32.totalorder %s1329_s5, 0  ;;  %s1105_s7 = scalar_lea.vmem %s200_s14, 2048 }
  0x36   : > { %p1106_p9 = scmp.ne.s32.totalorder %s200_s14, %s1105_s7  ;;  %p1113_p10 = scmp.lt.s32.totalorder %s200_s14, %s200_s14 }
  0x37   : > { %p967_p1 = pnand %p966_p4, %p1550_p8  ;;  %p1114_p0 = scmp.lt.s32.totalorder %s1105_s7, %s1105_s7 }
  0x39   : > { %p1096_p6 = pneg %p967_p1  ;;  %p1115_p13 = por %p1114_p0, %p1113_p10 }
  0x3b   : > { %p1108_p3 = pnand %p1106_p9, %p1096_p6 }
  0x3d   : > { %p1109_p5 = pneg %p1108_p3 }
  0x3f   : > { %p1116_p12 = pnand %p1115_p13, %p1109_p5 }
  0x41   : > { %1119 = shalt.err (!%p1116_p12)
}
  0x42   : > { %969 = dma.hbm_to_vmem [thread:$0]  (!%p967_p1), %s1538_s1, 2048, %s200_s14, [#allocation7], %s1211_s26, %s1211_s26, %s1212_s25  }
  0x43   : > { %265 = sbr.rel (%p1355_p2) target bundleno = 338 (0x152), region = 36  ;;  %s267_s13 = sand.u32 (!%p1355_p2), 1, %s1329_s5  }
  0x44   : > { %s269_s30 = sand.u32 (!%p1355_p2), 1, %s1192_s16   ;;  %s268_s22 = scalar_lea.sflag (!%p1355_p2), [#allocation4], %s267_s13 }
  0x45   : > { %s1388_s11 = sshll.u32 (!%p1355_p2), %s269_s30, 7 }
  0x46   : > { %s1391_s23 = scalar_lea.vmem (!%p1355_p2), [#allocation3], %s1388_s11 }
  0x48   : > { %1171 = dma.done.wait (%p1339_p11), %s268_s22, 2048  }
  0x49   : > { %1173 = vsyncadd (%p1339_p11), %s268_s22, 4294965248  ;;  %p1551_p4 = scmp.eq.s32.totalorder %s1329_s5, 0 }
  0x4b   : > { %1175 = dma.done.wait (%p1551_p4), [#allocation7], 2048   ;;  %p1552_p7 = pmov %p1551_p4 }
  0x4c   : > { %s1402_s26 = scalar_lea.vmem [#allocation8], %s1388_s11 }
  0x4d   : > { %1177 = vsyncadd (%p1552_p7), [#allocation7], 4294965248 }
  0x4e   : > { %1179 = dma.done.wait (%p1339_p11), %s268_s22, 2048  }
  0x4f   : > { %1181 = vsyncadd (%p1339_p11), %s268_s22, 4294965248  ;;  %v391_v0 = vld [vmem:[#allocation6 + $0x78] sm:$0xff]  ;;  %v390_v1 = vld [vmem:[#allocation6 + $0x70] sm:$0xff]  ;;  %s1440_s10 = scalar_lea.vmem [#allocation9], %s1388_s11  ;;  %s835_s8 = sshll.u32 %s1200_s18, 11 }
  0x50   : > { %868 = vmatprep.subr.mxu0 %v391_v0  ;;  %924 = vmatprep.subr.mxu1 %v391_v0  ;;  %v389_v2 = vld [vmem:[#allocation6 + $0x68] sm:$0xff]  ;;  %v388_v3 = vld [vmem:[#allocation6 + $0x60] sm:$0xff]  ;;  %v387_v4 = vld [vmem:[#allocation6 + $0x58] sm:$0xff]  ;;  %s674_s14 = sshll.u32 %s1440_s10, 4  ;;  %s1479_s7 = scalar_lea.hbm %s1541_s4, %s835_s8  ;;  %s1481_s14 = int_to_ptr.vmem [resolvable:$true] %s674_s14 }
  0x51   : > { %869 = vmatpush3.msra.mxu0 %v391_v0  ;;  %940 = vmatpush3.msra.mxu1 %v391_v0  ;;  %v386_v5 = vld [vmem:[#allocation6 + $0x50] sm:$0xff]  ;;  %v385_v6 = vld [vmem:[#allocation6 + $0x48] sm:$0xff]  ;;  %v384_v7 = vld [vmem:[#allocation6 + $0x40] sm:$0xff]  ;;  %s1491_s18 = scalar_lea.sflag [#allocation5], %s269_s30  ;;  %s1120_s9 = scalar_lea.vmem %s1481_s14, 2048 }
  0x52   : > { %870 = vmatprep.subr.mxu0 %v390_v1  ;;  %925 = vmatprep.subr.mxu1 %v390_v1  ;;  %v383_v8 = vld [vmem:[#allocation6 + $0x38] sm:$0xff]  ;;  %v382_v9 = vld [vmem:[#allocation6 + $0x30] sm:$0xff]  ;;  %v381_v10 = vld [vmem:[#allocation6 + $0x28] sm:$0xff]  ;;  %p1121_p11 = scmp.ne.s32.totalorder %s1481_s14, %s1120_s9  ;;  %p1553_p12 = scmp.ne.s32.totalorder %s1547_s28, 0 }
  0x53   : > { %871 = vmatpush3.msra.mxu0 %v390_v1  ;;  %941 = vmatpush3.msra.mxu1 %v390_v1  ;;  %v380_v11 = vld [vmem:[#allocation6 + $0x20] sm:$0xff]  ;;  %v379_v12 = vld [vmem:[#allocation6 + $0x18] sm:$0xff]  ;;  %v378_v13 = vld [vmem:[#allocation6 + $0x10] sm:$0xff]  ;;  %s1215_s12 = smov [#allocation9]  }
  0x54   : > { %872 = vmatprep.subr.mxu0 %v389_v2  ;;  %926 = vmatprep.subr.mxu1 %v389_v2  ;;  %v377_v14 = vld [vmem:[#allocation6 + $0x8] sm:$0xff]  ;;  %v376_v15 = vld [vmem:[#allocation6] sm:$0xff]  ;;  %v362_v20 = vld [vmem:[%s1391_s23 + $0x10] sm:$0xff]  ;;  %p1122_p13 = pnand %p1121_p11, %p1553_p12  ;;  %s1124_s13 = sshll.u32 %s1215_s12, 4  ;;  %s1125_s13 = int_to_ptr.vmem [resolvable:$false] %s1124_s13 }
  0x55   : > { %873 = vmatpush3.msra.mxu0 %v389_v2  ;;  %942 = vmatpush3.msra.mxu1 %v389_v2  ;;  %v360_v16 = vld [vmem:[%s1391_s23] sm:$0xff]  ;;  %v361_v18 = vld [vmem:[%s1391_s23 + $0x8] sm:$0xff]  ;;  %v370_v21 = vld [vmem:[%s1391_s23 + $0x50] sm:$0xff]  ;;  %s1126_s11 = scalar_lea.vmem %s1125_s13, 4096  ;;  %p1127_p8 = scmp.lt.s32.totalorder %s1481_s14, %s1125_s13 }
  0x56   : > { %874 = vmatprep.subr.mxu0 %v388_v3  ;;  %927 = vmatprep.subr.mxu1 %v388_v3  ;;  %v368_v17 = vld [vmem:[%s1391_s23 + $0x40] sm:$0xff]  ;;  %v369_v19 = vld [vmem:[%s1391_s23 + $0x48] sm:$0xff]  ;;  %v363_v22 = vld [vmem:[%s1391_s23 + $0x18] sm:$0xff]  ;;  %p1123_p2 = pneg %p1122_p13  ;;  %p1128_p1 = scmp.lt.s32.totalorder %s1126_s11, %s1120_s9 }
  0x57   : > { %875 = vmatpush3.msra.mxu0 %v388_v3  ;;  %943 = vmatpush3.msra.mxu1 %v388_v3  ;;  %v371_v23 = vld [vmem:[%s1391_s23 + $0x58] sm:$0xff]  ;;  %v364_v24 = vld [vmem:[%s1391_s23 + $0x20] sm:$0xff]  ;;  %v365_v26 = vld [vmem:[%s1391_s23 + $0x28] sm:$0xff] }
  0x58   : > { %876 = vmatprep.subr.mxu0 %v387_v4  ;;  %928 = vmatprep.subr.mxu1 %v387_v4  ;;  %v372_v25 = vld [vmem:[%s1391_s23 + $0x60] sm:$0xff]  ;;  %v373_v27 = vld [vmem:[%s1391_s23 + $0x68] sm:$0xff]  ;;  %v366_v28 = vld [vmem:[%s1391_s23 + $0x30] sm:$0xff]  ;;  %p1129_p6 = por %p1128_p1, %p1127_p8 }
  0x59   : > { %877 = vmatpush3.msra.mxu0 %v387_v4  ;;  %944 = vmatpush3.msra.mxu1 %v387_v4  ;;  %v374_v29 = vld [vmem:[%s1391_s23 + $0x70] sm:$0xff]  ;;  %v367_v30 = vld [vmem:[%s1391_s23 + $0x38] sm:$0xff]  ;;  %v589_v32 = vld [vmem:[%s1402_s26 + $0x8] sm:$0xff] }
  0x5a   : > { %878 = vmatprep.subr.mxu0 %v386_v5  ;;  %929 = vmatprep.subr.mxu1 %v386_v5  ;;  %v375_v31 = vld [vmem:[%s1391_s23 + $0x78] sm:$0xff]  ;;  %v597_v33 = vld [vmem:[%s1402_s26 + $0x48] sm:$0xff]  ;;  %v1429_v35 = vld [vmem:[%s1540_s3] ss:$0 sm:$0xff]  ;;  %p1130_p9 = pnand %p1129_p6, %p1123_p2 }
  0x5b   : > { %879 = vmatpush3.msra.mxu0 %v386_v5  ;;  %945 = vmatpush3.msra.mxu1 %v386_v5  ;;  %v588_v37 = vld [vmem:[%s1402_s26] sm:$0xff]  ;;  %v591_v43 = vld [vmem:[%s1402_s26 + $0x18] sm:$0xff]  ;;  %v590_v51 = vld [vmem:[%s1402_s26 + $0x10] sm:$0xff] }
  0x5c   : > { %880 = vmatprep.subr.mxu0 %v385_v6  ;;  %930 = vmatprep.subr.mxu1 %v385_v6  ;;  %v596_v38 = vld [vmem:[%s1402_s26 + $0x40] sm:$0xff]  ;;  %v599_v44 = vld [vmem:[%s1402_s26 + $0x58] sm:$0xff]  ;;  %v598_v52 = vld [vmem:[%s1402_s26 + $0x50] sm:$0xff] }
  0x5d   : > { %881 = vmatpush3.msra.mxu0 %v385_v6  ;;  %946 = vmatpush3.msra.mxu1 %v385_v6  ;;  %v593_v59 = vld [vmem:[%s1402_s26 + $0x28] sm:$0xff]  ;;  %v592_v3 = vld [vmem:[%s1402_s26 + $0x20] sm:$0xff] }
  0x5e   : > { %882 = vmatprep.subr.mxu0 %v384_v7  ;;  %931 = vmatprep.subr.mxu1 %v384_v7  ;;  %v601_v60 = vld [vmem:[%s1402_s26 + $0x68] sm:$0xff]  ;;  %v600_v4 = vld [vmem:[%s1402_s26 + $0x60] sm:$0xff] }
  0x5f   : > { %883 = vmatpush3.msra.mxu0 %v384_v7  ;;  %947 = vmatpush3.msra.mxu1 %v384_v7 }
  0x60   : > { %884 = vmatprep.subr.mxu0 %v383_v8  ;;  %932 = vmatprep.subr.mxu1 %v383_v8 }
  0x61   : > { %885 = vmatpush3.msra.mxu0 %v383_v8  ;;  %948 = vmatpush3.msra.mxu1 %v383_v8 }
  0x62   : > { %886 = vmatprep.subr.mxu0 %v382_v9  ;;  %933 = vmatprep.subr.mxu1 %v382_v9 }
  0x63   : > { %887 = vmatpush3.msra.mxu0 %v382_v9  ;;  %949 = vmatpush3.msra.mxu1 %v382_v9 }
  0x64   : > { %888 = vmatprep.subr.mxu0 %v381_v10  ;;  %934 = vmatprep.subr.mxu1 %v381_v10 }
  0x65   : > { %889 = vmatpush3.msra.mxu0 %v381_v10  ;;  %950 = vmatpush3.msra.mxu1 %v381_v10 }
  0x66   : > { %890 = vmatprep.subr.mxu0 %v380_v11  ;;  %935 = vmatprep.subr.mxu1 %v380_v11 }
  0x67   : > { %891 = vmatpush3.msra.mxu0 %v380_v11  ;;  %951 = vmatpush3.msra.mxu1 %v380_v11  ;;  %v595_v11 = vld [vmem:[%s1402_s26 + $0x38] sm:$0xff] }
  0x68   : > { %892 = vmatprep.subr.mxu0 %v379_v12  ;;  %936 = vmatprep.subr.mxu1 %v379_v12 }
  0x69   : > { %893 = vmatpush3.msra.mxu0 %v379_v12  ;;  %952 = vmatpush3.msra.mxu1 %v379_v12  ;;  %v603_v12 = vld [vmem:[%s1402_s26 + $0x78] sm:$0xff] }
  0x6a   : > { %894 = vmatprep.subr.mxu0 %v378_v13  ;;  %937 = vmatprep.subr.mxu1 %v378_v13 }
  0x6b   : > { %895 = vmatpush3.msra.mxu0 %v378_v13  ;;  %953 = vmatpush3.msra.mxu1 %v378_v13 }
  0x6c   : > { %896 = vmatprep.subr.mxu0 %v377_v14  ;;  %938 = vmatprep.subr.mxu1 %v377_v14 }
  0x6d   : > { %897 = vmatpush3.msra.mxu0 %v377_v14  ;;  %954 = vmatpush3.msra.mxu1 %v377_v14 }
  0x6e   : > { %898 = vmatprep.subr.mxu0 %v376_v15  ;;  %939 = vmatprep.subr.mxu1 %v376_v15 }
  0x6f   : > { %899 = vmatpush3.msra.mxu0 %v376_v15  ;;  %955 = vmatpush3.msra.mxu1 %v376_v15 }
  0x70   : > { %900 = vmatprep.mubr.f32.mxu0 %v360_v16  ;;  %912 = vmatprep.mubr.f32.mxu1 %v368_v17 }
  0x71   : > { %901 = vmatmul.mubr.f32.vlgmr.msra.gmra.mxu0 %v361_v18  ;;  %913 = vmatmul.mubr.f32.vlgmr.msra.gmra.mxu1 %v369_v19  ;;  %v594_v19 = vld [vmem:[%s1402_s26 + $0x30] sm:$0xff] }
  0x72   : > { %903 = vmatprep.mubr.f32.mxu0 %v362_v20  ;;  %915 = vmatprep.mubr.f32.mxu1 %v370_v21  ;;  %v602_v20 = vld [vmem:[%s1402_s26 + $0x70] sm:$0xff] }
  0x75   : > { %904 = vmatmul.mubr.f32.gmra.mxu0 %v363_v22  ;;  %916 = vmatmul.mubr.f32.gmra.mxu1 %v371_v23 }
  0x76   : > { %906 = vmatprep.mubr.f32.mxu0 %v364_v24  ;;  %918 = vmatprep.mubr.f32.mxu1 %v372_v25 }
  0x79   : > { %907 = vmatmul.mubr.f32.gmra.mxu0 %v365_v26  ;;  %919 = vmatmul.mubr.f32.gmra.mxu1 %v373_v27 }
  0x7a   : > { %909 = vmatprep.mubr.f32.mxu0 %v366_v28  ;;  %921 = vmatprep.mubr.f32.mxu1 %v374_v29 }
  0x7d   : > { %910 = vmatmul.mubr.f32.gmra.mxu0 %v367_v30  ;;  %922 = vmatmul.mubr.f32.gmra.mxu1 %v375_v31 }
 0x131   : > { %v902_v34 = vpop.f32.mrf.mxu0  ;;  %v914_v36 = vpop.f32.mrf.mxu1 }
 0x132   : > { %v605_v39 = vadd.f32 %v902_v34, %v589_v32  ;;  %v613_v40 = vadd.f32 %v914_v36, %v597_v33 }
 0x133   : > { %v458_v41 = vpop.f32.mrf.mxu0  ;;  %v498_v42 = vpop.f32.mrf.mxu1 }
 0x134   : > { %v628_v45 = vadd.f32 %v1429_v35, %v605_v39  ;;  %v636_v46 = vadd.f32 %v1429_v35, %v613_v40  ;;  %v604_v47 = vadd.f32 %v588_v37, %v458_v41  ;;  %v612_v48 = vadd.f32 %v596_v38, %v498_v42 }
 0x135   : > { %v905_v49 = vpop.f32.mrf.mxu0  ;;  %v917_v50 = vpop.f32.mrf.mxu1 }
 0x136   : > { %644 = vst [vmem:[%s1440_s10 + $0x8] sm:$0xff] %v628_v45  ;;  %652 = vst [vmem:[%s1440_s10 + $0x48] sm:$0xff] %v636_v46  ;;  %v627_v53 = vadd.f32 %v1429_v35, %v604_v47  ;;  %v635_v54 = vadd.f32 %v1429_v35, %v612_v48  ;;  %v607_v55 = vadd.f32 %v905_v49, %v591_v43 }
 0x137   : > { %v615_v56 = vadd.f32 %v917_v50, %v599_v44  ;;  %v468_v57 = vpop.f32.mrf.mxu0  ;;  %v508_v58 = vpop.f32.mrf.mxu1 }
 0x138   : > { %643 = vst [vmem:[%s1440_s10] sm:$0xff] %v627_v53  ;;  %651 = vst [vmem:[%s1440_s10 + $0x40] sm:$0xff] %v635_v54  ;;  %v630_v61 = vadd.f32 %v1429_v35, %v607_v55  ;;  %v606_v63 = vadd.f32 %v590_v51, %v468_v57  ;;  %v614_v0 = vadd.f32 %v598_v52, %v508_v58 }
 0x139   : > { %v638_v62 = vadd.f32 %v1429_v35, %v615_v56  ;;  %v908_v1 = vpop.f32.mrf.mxu0  ;;  %v920_v2 = vpop.f32.mrf.mxu1 }
 0x13a   : > { %646 = vst [vmem:[%s1440_s10 + $0x18] sm:$0xff] %v630_v61  ;;  %v629_v5 = vadd.f32 %v1429_v35, %v606_v63  ;;  %v637_v6 = vadd.f32 %v1429_v35, %v614_v0  ;;  %v609_v7 = vadd.f32 %v908_v1, %v593_v59  ;;  %v617_v8 = vadd.f32 %v920_v2, %v601_v60 }
 0x13b   : > { %654 = vst [vmem:[%s1440_s10 + $0x58] sm:$0xff] %v638_v62  ;;  %v478_v9 = vpop.f32.mrf.mxu0  ;;  %v518_v10 = vpop.f32.mrf.mxu1 }
 0x13c   : > { %645 = vst [vmem:[%s1440_s10 + $0x10] sm:$0xff] %v629_v5  ;;  %653 = vst [vmem:[%s1440_s10 + $0x50] sm:$0xff] %v637_v6  ;;  %v632_v13 = vadd.f32 %v1429_v35, %v609_v7  ;;  %v640_v14 = vadd.f32 %v1429_v35, %v617_v8  ;;  %v608_v15 = vadd.f32 %v592_v3, %v478_v9 }
 0x13d   : > { %v616_v16 = vadd.f32 %v600_v4, %v518_v10  ;;  %v911_v17 = vpop.f32.mrf.mxu0  ;;  %v923_v18 = vpop.f32.mrf.mxu1 }
 0x13e   : > { %648 = vst [vmem:[%s1440_s10 + $0x28] sm:$0xff] %v632_v13  ;;  %656 = vst [vmem:[%s1440_s10 + $0x68] sm:$0xff] %v640_v14  ;;  %v631_v21 = vadd.f32 %v1429_v35, %v608_v15  ;;  %v611_v23 = vadd.f32 %v911_v17, %v595_v11  ;;  %v619_v24 = vadd.f32 %v923_v18, %v603_v12 }
 0x13f   : > { %v639_v22 = vadd.f32 %v1429_v35, %v616_v16  ;;  %v488_v25 = vpop.f32.mrf.mxu0  ;;  %v528_v26 = vpop.f32.mrf.mxu1 }
 0x140   : > { %647 = vst [vmem:[%s1440_s10 + $0x20] sm:$0xff] %v631_v21  ;;  %v634_v27 = vadd.f32 %v1429_v35, %v611_v23  ;;  %v642_v28 = vadd.f32 %v1429_v35, %v619_v24  ;;  %v610_v29 = vadd.f32 %v594_v19, %v488_v25  ;;  %v618_v30 = vadd.f32 %v602_v20, %v528_v26 }
 0x141   : > { %655 = vst [vmem:[%s1440_s10 + $0x60] sm:$0xff] %v639_v22 }
 0x142   : > { %650 = vst [vmem:[%s1440_s10 + $0x38] sm:$0xff] %v634_v27  ;;  %658 = vst [vmem:[%s1440_s10 + $0x78] sm:$0xff] %v642_v28  ;;  %v633_v31 = vadd.f32 %v1429_v35, %v610_v29  ;;  %v641_v32 = vadd.f32 %v1429_v35, %v618_v30 }
 0x144   : > { %649 = vst [vmem:[%s1440_s10 + $0x30] sm:$0xff] %v633_v31  ;;  %657 = vst [vmem:[%s1440_s10 + $0x70] sm:$0xff] %v641_v32 }
 0x145   : > { %1133 = shalt.err (!%p1130_p9)
}
 0x146   : > { %s1134_s30 = scalar_lea.hbm %s1479_s7, 2048  ;;  %s1138_s26 = scalar_lea.hbm %s1541_s4, 4096 }
 0x147   : > { %p1135_p3 = scmp.ne.s32.totalorder %s1479_s7, %s1134_s30  ;;  %p1139_p0 = scmp.lt.s32.totalorder %s1479_s7, %s1541_s4 }
 0x148   : > { %p1140_p4 = scmp.lt.s32.totalorder %s1138_s26, %s1134_s30 }
 0x149   : > { %p1136_p5 = pnand %p1135_p3, %p1553_p12 }
 0x14a   : > { %p1141_p7 = por %p1140_p4, %p1139_p0 }
 0x14b   : > { %p1137_p10 = pneg %p1136_p5 }
 0x14d   : > { %p1142_p11 = pnand %p1141_p7, %p1137_p10 }
 0x14f   : > { %1145 = shalt.err (!%p1142_p11)
}
 0x150   : > { %s1216_s10 = smov 128   ;;  %s1217_s8 = smov 8  }
 0x151   : > { %964 = dma.vmem_to_hbm [thread:$0]  (%p1553_p12), %s1481_s14, 2048, %s1479_s7, %s1491_s18, %s1216_s10, %s1216_s10, %s1217_s8  }
 0x152 PF: > { %s689_s24 = sand.u32 1, %s1188_s15   ;;  %p1554_p13 = scmp.ne.s32.totalorder %s1548_s6, 0 }
 0x153   : > { %p1555_p2 = scmp.ge.s32.totalorder %s1208_s20, 2  ;;  %s690_s29 = scalar_lea.sflag [#allocation5], %s689_s24 }
 0x155   : > { %p978_p8 = pnand %p1555_p2, %p1554_p13 }
 0x157   : > { %p979_p1 = pneg %p978_p8 }
 0x159   : > { %1183 = dma.done.wait (%p979_p1), %s690_s29, 2048  }
 0x15a   : > { %1185 = vsyncadd (%p979_p1), %s690_s29, 4294965248  ;;  %s21_s20 = sadd.s32 1, %s1208_s20   ;;  %s1556_s15 = smov %s1192_s16 }
 0x15b   : > { %p18_p6 = scmp.ge.s32.totalorder %s21_s20, 4   ;;  %s1557_s16 = smov %s1196_s17 }
 0x15c   : > { %s1558_s17 = smov %s1294_s27  ;;  %s1559_s18 = smov %s1204_s19 }
 0x15d   : > { %s1560_s19 = smov %s1562_s21  ;;  %20 = sbr.rel (!%p18_p6) target bundleno = 7 (0x7), region = 108 }
 0x162   :  { %695 = vsyncpa [#allocation4], 1 }
 0x163   :  { %697 = vsyncpa [#allocation4 + $0x1], 1 }
 0x164   :  { %698 = vsyncpa [#allocation7], 1 }
 0x165   :  { %699 = vsyncpa [#allocation5], 1 }
 0x166   :  { %701 = vsyncpa [#allocation5 + $0x1], 1 }

</bundles_post_ra>
